<compile_context>
chip_gen: v6e
topology: v6e:2x2x1
jax: 0.10.0
libtpu: 0.0.40
codegen_flags: <defaults>
</compile_context>

<pallas_src>
import functools
import math

import jax
import jax.numpy as jnp
from jax.experimental import pallas as pl
from jax.experimental.pallas import tpu as pltpu

NUM_ENCODING_FUNCTIONS = 6


def _round_up(n, m):
    return ((n + m - 1) // m) * m


def _pos_enc_kernel(x_ref, o_ref, *, num_fns, d):
    # x_ref: (d, tn)                      -- N on lanes (lane-dense)
    # o_ref: (d * (1 + 2*num_fns), tn)    -- part k lives in rows [k*d, (k+1)*d)
    x = x_ref[...].astype(jnp.float32)            # f32 compute regardless of I/O dtype
    o_ref[0:d, :] = x.astype(o_ref.dtype)         # identity part
    for i in range(num_fns):
        scaled = (2.0 ** i) * x                   # VPU elementwise
        base = (1 + 2 * i) * d
        # TODO(synk): a double-angle recurrence (2 EUP calls instead of 12 per
        # element) was considered but skipped: error compounds over 5 frequency
        # doublings vs. the 1e-5 tolerance, and the kernel is HBM/store bound
        # (output bytes = 13x input bytes) once lane-dense.
        o_ref[base:base + d, :] = jnp.sin(scaled).astype(o_ref.dtype)       # EUP
        o_ref[base + d:base + 2 * d, :] = jnp.cos(scaled).astype(o_ref.dtype)


def positional_encoding(x, num_encoding_functions=NUM_ENCODING_FUNCTIONS, *,
                        tile_lanes=8192):
    """Pallas TPU implementation of PositionalEncoding.forward."""
    orig_shape = x.shape
    d = orig_shape[-1]
    n = int(math.prod(orig_shape[:-1]))
    out_d = d * (1 + 2 * num_encoding_functions)

    # Lane-dense slab: (d, n) with the flattened axis N on the lane dimension.
    x_t = x.reshape(n, d).T

    # Lane-axis tile.  At tn=8192, d=3, f32: ~96 KiB in / ~1.25 MiB out per
    # grid step; double-buffered (in+out) ~= 2.8 MiB of VMEM, which fits every
    # generation (incl. v7x's 64 MiB) within the default scoped limit.
    tn = min(tile_lanes, _round_up(n, 128))
    grid = (pl.cdiv(n, tn),)   # ragged last block handled by Pallas edge masking

    kernel = functools.partial(_pos_enc_kernel,
                               num_fns=num_encoding_functions, d=d)

    out_t = pl.pallas_call(
        kernel,
        out_shape=jax.ShapeDtypeStruct((out_d, n), x.dtype),
        grid_spec=pltpu.PrefetchScalarGridSpec(
            num_scalar_prefetch=0,
            grid=grid,
            in_specs=[pl.BlockSpec((d, tn), lambda j: (0, j))],
            out_specs=pl.BlockSpec((out_d, tn), lambda j: (0, j)),
        ),
        compiler_params=pltpu.CompilerParams(
            dimension_semantics=("parallel",)),   # megacore-shardable on v7x
    )(x_t)

    # (13*d, n) -> (n, 13*d).  Row ordering k*d + d' already matches the torch
    # cat([x, sin0, cos0, sin1, cos1, ...], dim=-1) block interleave.
    out2d = out_t.T
    return out2d.reshape(*orig_shape[:-1], out_d)


def _reference(x, num_encoding_functions=NUM_ENCODING_FUNCTIONS):
    encoding = [x]
    for i in range(num_encoding_functions):
        encoding.append(jnp.sin(2.0 ** i * x))
        encoding.append(jnp.cos(2.0 ** i * x))
    return jnp.concatenate(encoding, axis=-1)


if __name__ == "__main__":
    key = jax.random.PRNGKey(0)
    k0, k1 = jax.random.split(key)

    # Small NeRF-like input: batch=2, rays=100, coord dim=3 -> flattened N=200
    # (deliberately not a multiple of 128 to exercise the edge-masked path).
    x = jax.random.normal(k0, (2, 100, 3), dtype=jnp.float32)
    out = jax.block_until_ready(positional_encoding(x))
    ref = _reference(x)
    assert out.shape == (2, 100, 3 * (1 + 2 * NUM_ENCODING_FUNCTIONS)), out.shape
    assert jnp.allclose(out, ref, atol=1e-5, rtol=1e-5), "mismatch vs reference"

    # Multi-step grid + ragged last block (517 = 4*128 + 5) with a small tile.
    x2 = jax.random.normal(k1, (517, 3), dtype=jnp.float32)
    out2 = jax.block_until_ready(positional_encoding(x2, tile_lanes=128))
    ref2 = _reference(x2)
    assert out2.shape == (517, 39), out2.shape
    assert jnp.allclose(out2, ref2, atol=1e-5, rtol=1e-5), "mismatch (tiled) vs reference"

    print("KERNEL_OK")
</pallas_src>

<mosaic_0001>
module attributes {stable_mosaic.version = 11 : i64} {
  func.func @_pos_enc_kernel(%arg0: i32, %arg1: memref<3x256xf32, #tpu.memory_space<vmem>>, %arg2: memref<39x256xf32, #tpu.memory_space<vmem>>) attributes {dimension_semantics = [#tpu.dimension_semantics<parallel>], iteration_bounds = array<i64: 1>, scalar_prefetch = 0 : i64, scratch_operands = 0 : i64, tpu.core_type = #tpu.core_type<tc>, window_params = [{transform_indices = @transform_0, window_bounds = array<i64: 3, 256>}, {transform_indices = @transform_1, window_bounds = array<i64: 39, 256>}]} {
    %c0 = arith.constant 0 : index
    %c0_0 = arith.constant 0 : index
    %0 = vector.load %arg1[%c0, %c0_0] : memref<3x256xf32, #tpu.memory_space<vmem>>, vector<3x256xf32>
    %c0_1 = arith.constant 0 : index
    %c0_2 = arith.constant 0 : index
    %1 = vector.load %arg2[%c0_1, %c0_2] : memref<39x256xf32, #tpu.memory_space<vmem>>, vector<3x256xf32>
    tpu.vector_store %arg2[%c0_1, %c0_2], %0 {strides = array<i32>} : memref<39x256xf32, #tpu.memory_space<vmem>>, vector<3x256xf32>,
    %cst = arith.constant 1.000000e+00 : f32
    %2 = vector.broadcast %cst : f32 to vector<3x256xf32>
    %3 = arith.mulf %2, %0 : vector<3x256xf32>
    %4 = math.sin %3 : vector<3x256xf32>
    %c3 = arith.constant 3 : index
    %c0_3 = arith.constant 0 : index
    %5 = vector.load %arg2[%c3, %c0_3] : memref<39x256xf32, #tpu.memory_space<vmem>>, vector<3x256xf32>
    tpu.vector_store %arg2[%c3, %c0_3], %4 {strides = array<i32>} : memref<39x256xf32, #tpu.memory_space<vmem>>, vector<3x256xf32>,
    %6 = math.cos %3 : vector<3x256xf32>
    %c6 = arith.constant 6 : index
    %c0_4 = arith.constant 0 : index
    %7 = vector.load %arg2[%c6, %c0_4] : memref<39x256xf32, #tpu.memory_space<vmem>>, vector<3x256xf32>
    tpu.vector_store %arg2[%c6, %c0_4], %6 {strides = array<i32>} : memref<39x256xf32, #tpu.memory_space<vmem>>, vector<3x256xf32>,
    %cst_5 = arith.constant 2.000000e+00 : f32
    %8 = vector.broadcast %cst_5 : f32 to vector<3x256xf32>
    %9 = arith.mulf %8, %0 : vector<3x256xf32>
    %10 = math.sin %9 : vector<3x256xf32>
    %c9 = arith.constant 9 : index
    %c0_6 = arith.constant 0 : index
    %11 = vector.load %arg2[%c9, %c0_6] : memref<39x256xf32, #tpu.memory_space<vmem>>, vector<3x256xf32>
    tpu.vector_store %arg2[%c9, %c0_6], %10 {strides = array<i32>} : memref<39x256xf32, #tpu.memory_space<vmem>>, vector<3x256xf32>,
    %12 = math.cos %9 : vector<3x256xf32>
    %c12 = arith.constant 12 : index
    %c0_7 = arith.constant 0 : index
    %13 = vector.load %arg2[%c12, %c0_7] : memref<39x256xf32, #tpu.memory_space<vmem>>, vector<3x256xf32>
    tpu.vector_store %arg2[%c12, %c0_7], %12 {strides = array<i32>} : memref<39x256xf32, #tpu.memory_space<vmem>>, vector<3x256xf32>,
    %cst_8 = arith.constant 4.000000e+00 : f32
    %14 = vector.broadcast %cst_8 : f32 to vector<3x256xf32>
    %15 = arith.mulf %14, %0 : vector<3x256xf32>
    %16 = math.sin %15 : vector<3x256xf32>
    %c15 = arith.constant 15 : index
    %c0_9 = arith.constant 0 : index
    %17 = vector.load %arg2[%c15, %c0_9] : memref<39x256xf32, #tpu.memory_space<vmem>>, vector<3x256xf32>
    tpu.vector_store %arg2[%c15, %c0_9], %16 {strides = array<i32>} : memref<39x256xf32, #tpu.memory_space<vmem>>, vector<3x256xf32>,
    %18 = math.cos %15 : vector<3x256xf32>
    %c18 = arith.constant 18 : index
    %c0_10 = arith.constant 0 : index
    %19 = vector.load %arg2[%c18, %c0_10] : memref<39x256xf32, #tpu.memory_space<vmem>>, vector<3x256xf32>
    tpu.vector_store %arg2[%c18, %c0_10], %18 {strides = array<i32>} : memref<39x256xf32, #tpu.memory_space<vmem>>, vector<3x256xf32>,
    %cst_11 = arith.constant 8.000000e+00 : f32
    %20 = vector.broadcast %cst_11 : f32 to vector<3x256xf32>
    %21 = arith.mulf %20, %0 : vector<3x256xf32>
    %22 = math.sin %21 : vector<3x256xf32>
    %c21 = arith.constant 21 : index
    %c0_12 = arith.constant 0 : index
    %23 = vector.load %arg2[%c21, %c0_12] : memref<39x256xf32, #tpu.memory_space<vmem>>, vector<3x256xf32>
    tpu.vector_store %arg2[%c21, %c0_12], %22 {strides = array<i32>} : memref<39x256xf32, #tpu.memory_space<vmem>>, vector<3x256xf32>,
    %24 = math.cos %21 : vector<3x256xf32>
    %c24 = arith.constant 24 : index
    %c0_13 = arith.constant 0 : index
    %25 = vector.load %arg2[%c24, %c0_13] : memref<39x256xf32, #tpu.memory_space<vmem>>, vector<3x256xf32>
    tpu.vector_store %arg2[%c24, %c0_13], %24 {strides = array<i32>} : memref<39x256xf32, #tpu.memory_space<vmem>>, vector<3x256xf32>,
    %cst_14 = arith.constant 1.600000e+01 : f32
    %26 = vector.broadcast %cst_14 : f32 to vector<3x256xf32>
    %27 = arith.mulf %26, %0 : vector<3x256xf32>
    %28 = math.sin %27 : vector<3x256xf32>
    %c27 = arith.constant 27 : index
    %c0_15 = arith.constant 0 : index
    %29 = vector.load %arg2[%c27, %c0_15] : memref<39x256xf32, #tpu.memory_space<vmem>>, vector<3x256xf32>
    tpu.vector_store %arg2[%c27, %c0_15], %28 {strides = array<i32>} : memref<39x256xf32, #tpu.memory_space<vmem>>, vector<3x256xf32>,
    %30 = math.cos %27 : vector<3x256xf32>
    %c30 = arith.constant 30 : index
    %c0_16 = arith.constant 0 : index
    %31 = vector.load %arg2[%c30, %c0_16] : memref<39x256xf32, #tpu.memory_space<vmem>>, vector<3x256xf32>
    tpu.vector_store %arg2[%c30, %c0_16], %30 {strides = array<i32>} : memref<39x256xf32, #tpu.memory_space<vmem>>, vector<3x256xf32>,
    %cst_17 = arith.constant 3.200000e+01 : f32
    %32 = vector.broadcast %cst_17 : f32 to vector<3x256xf32>
    %33 = arith.mulf %32, %0 : vector<3x256xf32>
    %34 = math.sin %33 : vector<3x256xf32>
    %c33 = arith.constant 33 : index
    %c0_18 = arith.constant 0 : index
    %35 = vector.load %arg2[%c33, %c0_18] : memref<39x256xf32, #tpu.memory_space<vmem>>, vector<3x256xf32>
    tpu.vector_store %arg2[%c33, %c0_18], %34 {strides = array<i32>} : memref<39x256xf32, #tpu.memory_space<vmem>>, vector<3x256xf32>,
    %36 = math.cos %33 : vector<3x256xf32>
    %c36 = arith.constant 36 : index
    %c0_19 = arith.constant 0 : index
    %37 = vector.load %arg2[%c36, %c0_19] : memref<39x256xf32, #tpu.memory_space<vmem>>, vector<3x256xf32>
    tpu.vector_store %arg2[%c36, %c0_19], %36 {strides = array<i32>} : memref<39x256xf32, #tpu.memory_space<vmem>>, vector<3x256xf32>,
    return
  }
  func.func @transform_0(%arg0: i32) -> (i32, i32) {
    %c0_i32 = arith.constant 0 : i32
    %c0_i32_0 = arith.constant 0 : i32
    return %c0_i32, %arg0 : i32, i32
  }
  func.func @transform_1(%arg0: i32) -> (i32, i32) {
    %c0_i32 = arith.constant 0 : i32
    %c0_i32_0 = arith.constant 0 : i32
    return %c0_i32, %arg0 : i32, i32
  }
}

</mosaic_0001>

<bundles_post_ra>
// kernel: tpu_custom_call.1
= control target key start
LH: loop header
LB: loop body
LE: loop exit
PB: predicated region body
PF: predicated region fallthrough
CT: control target
= control target key end

     0   :  { %6 = vsyncpa [#allocation3], 0  ;;  %s2069_s0 = inlined_call_operand.hbm [shape: f32[3,200], index: 0, kind: input, shape index: {}]   ;;  %s2070_s1 = inlined_call_operand.hbm [shape: f32[39,200], index: 1, kind: output, shape index: {}]  }
   0x1   :  { %7 = vsyncpa [#allocation4], 0  ;;  %s1535_s6 = smov [#allocation2]  }
   0x2   :  { %s14_s7 = sshll.u32 %s1535_s6, 4  ;;  %s15_s7 = int_to_ptr.vmem [resolvable:$true] %s14_s7 }
   0x3   :  { %s1499_s8 = scalar_lea.vmem %s15_s7, 128  ;;  %p1504_p1 = scmp.lt.s32.totalorder %s15_s7, %s15_s7 }
   0x4   :  { %p1500_p0 = scmp.ne.s32.totalorder %s15_s7, %s1499_s8  ;;  %p1505_p2 = scmp.lt.s32.totalorder %s1499_s8, %s1499_s8 }
   0x6   :  { %p1506_p3 = por %p1505_p2, %p1504_p1 }
   0x8   :  { %p1507_p4 = pnand %p1506_p3, %p1500_p0 }
   0xa   :  { %1510 = shalt.err (!%p1507_p4)
}
   0xb   :  { %17 = dma.hbm_to_vmem [thread:$0]  %s2069_s0, 128, %s15_s7, [#allocation3]  }
   0xc   :  { %1531 = dma.done.wait [#allocation3], 128  }
   0xd   :  { %1532 = vsyncadd [#allocation3], 4294967168  ;;  %v1558_v0 = vld [vmem:[#allocation2] sm:$0x77]  ;;  %v1536_v27 = vmov 683565275  }
   0xe   :  { %25 = vst [vmem:[#allocation5] sm:$0x7] %v1558_v0  ;;  %v23_v1 = vcombine.high %v1558_v0, %v1558_v0  ;;  %v27_v2 = vand.u32 2147483647, %v1558_v0  ;;  %v30_v3 = vand.u32 2139095040, %v1558_v0  ;;  %v1566_v4 = vmul.f32 2.0, %v1558_v0 }
   0xf   :  { %v1569_v5 = vmul.f32 4.0, %v1558_v0  ;;  %v1537_v29 = vmov 2475754826   ;;  %v1538_v31 = vmov 2131351028   ;;  %vm29_vm13 = vcmp.lt.s32.totalorder %v1558_v0, 0 }
  0x10   :  { %26 = vst [vmem:[#allocation5 + $0x8] sm:$0x7] %v23_v1  ;;  %v31_v6 = vshrl.u32 %v30_v3, 23  ;;  %v34_v7 = vand.u32 8388607, %v27_v2  ;;  %v256_v9 = vand.u32 2139095040, %v1566_v4 }
  0x11   :  { %v253_v8 = vand.u32 2147483647, %v1566_v4  ;;  %v477_v13 = vand.u32 2139095040, %v1569_v5  ;;  %v1539_v33 = vmov 2102212464   ;;  %s1542_s0 = smov [#allocation5]  }
  0x12   :  { %v1384_v10 = vadd.s32 4294967169, %v31_v6  ;;  %v257_v11 = vshrl.u32 %v256_v9, 23  ;;  %v35_v15 = vor.u32 8388608, %v34_v7  ;;  %v1540_v35 = vmov 920167782   ;;  %s1372_s11 = sshll.u32 %s1542_s0, 4  ;;  %s1373_s11 = int_to_ptr.vmem [resolvable:$true] %s1372_s11 }
  0x13   :  { %v260_v12 = vand.u32 8388607, %v253_v8  ;;  %v478_v18 = vshrl.u32 %v477_v13, 23  ;;  %v1541_v42 = vmov 1326507024   ;;  %s1511_s12 = scalar_lea.vmem %s1373_s11, 1280  ;;  %p1516_p6 = scmp.lt.s32.totalorder %s1373_s11, %s1373_s11 }
  0x14   :  { %v37_v14 = vadd.s32 1, %v1384_v10  ;;  %v1392_v16 = vadd.s32 4294967169, %v257_v11  ;;  %v1578_v23 = vshll.u32 %v35_v15, 8  ;;  %vm1679_vm14 = vcmp.le.f32.partialorder %v27_v2, 0.7853982  ;;  %p1512_p5 = scmp.ne.s32.totalorder %s1373_s11, %s1511_s12  ;;  %p1517_p7 = scmp.lt.s32.totalorder %s1511_s12, %s1511_s12 }
  0x15   :  { %v261_v17 = vor.u32 8388608, %v260_v12  ;;  %v1582_v25 = vadd.s32 4294967169, %v478_v18 }
  0x16   :  { %vm38_vm0 = vcmp.gt.s32.totalorder %v37_v14, 0  ;;  %v263_v20 = vadd.s32 1, %v1392_v16  ;;  %p1518_p8 = por %p1517_p7, %p1516_p6 }
  0x17   :  { %v39_v19 = vsel %vm38_vm0, %v37_v14, 0  ;;  %v1580_v24 = vshll.u32 %v261_v17, 8 }
  0x18   :  { %v40_v21 = vshrl.u32 %v39_v19, 5  ;;  %v41_v22 = vand.u32 31, %v39_v19  ;;  %vm264_vm1 = vcmp.gt.s32.totalorder %v263_v20, 0  ;;  %p1519_p9 = pnand %p1518_p8, %p1512_p5 }
  0x19   :  { %v265_v47 = vsel %vm264_vm1, %v263_v20, 0 }
  0x1a   :  { %v42_v26 = vsub.s32 32, %v41_v22  ;;  %v44_v28 = vshll.u32 %v1536_v27, %v41_v22  ;;  %v47_v30 = vshll.u32 %v1537_v29, %v41_v22  ;;  %v50_v32 = vshll.u32 %v1538_v31, %v41_v22 }
  0x1b   :  { %v53_v34 = vshll.u32 %v1539_v33, %v41_v22  ;;  %v56_v36 = vshll.u32 %v1540_v35, %v41_v22  ;;  %vm59_vm2 = vcmp.lt.s32.totalorder %v40_v21, 1  ;;  %vm60_vm3 = vcmp.lt.s32.totalorder %v40_v21, 2 }
  0x1c   :  { %v43_v37 = vshrl.u32 %v1536_v27, %v42_v26  ;;  %v45_v38 = vshrl.u32 %v1537_v29, %v42_v26  ;;  %v48_v39 = vshrl.u32 %v1538_v31, %v42_v26  ;;  %v51_v40 = vshrl.u32 %v1539_v33, %v42_v26 }
  0x1d   :  { %v54_v41 = vshrl.u32 %v1540_v35, %v42_v26  ;;  %v57_v43 = vshrl.u32 %v1541_v42, %v42_v26  ;;  %vm61_vm4 = vcmp.lt.s32.totalorder %v40_v21, 3  ;;  %vm62_vm5 = vcmp.lt.s32.totalorder %v40_v21, 4 }
  0x1e   :  { %v46_v44 = vor.u32 %v45_v38, %v44_v28  ;;  %v49_v45 = vor.u32 %v48_v39, %v47_v30  ;;  %v52_v46 = vor.u32 %v51_v40, %v50_v32  ;;  %v266_v50 = vshrl.u32 %v265_v47, 5 }
  0x1f   :  { %v55_v48 = vor.u32 %v54_v41, %v53_v34  ;;  %v58_v49 = vor.u32 %v57_v43, %v56_v36  ;;  %v267_v51 = vand.u32 31, %v265_v47  ;;  %v484_v30 = vadd.s32 1, %v1582_v25 }
  0x20   :  { %v63_v52 = vsel %vm59_vm2, %v43_v37, %v46_v44  ;;  %v64_v53 = vsel %vm62_vm5, %v52_v46, 2102212464  ;;  %v67_v54 = vsel %vm59_vm2, %v46_v44, %v49_v45  ;;  %v71_v55 = vsel %vm59_vm2, %v49_v45, %v52_v46 }
  0x21   :  { %v65_v56 = vsel %vm61_vm4, %v49_v45, %v64_v53  ;;  %v68_v57 = vsel %vm62_vm5, %v55_v48, 920167782  ;;  %v72_v58 = vsel %vm62_vm5, %v58_v49, 1326507024  ;;  %v268_v59 = vsub.s32 32, %v267_v51 }
  0x22   :  { %v66_v60 = vsel %vm60_vm3, %v63_v52, %v65_v56  ;;  %v69_v61 = vsel %vm61_vm4, %v52_v46, %v68_v57  ;;  %v73_v62 = vsel %vm61_vm4, %v55_v48, %v72_v58  ;;  %v270_v63 = vshll.u32 %v1536_v27, %v267_v51 }
  0x23   :  { %v70_v1 = vsel %vm60_vm3, %v67_v54, %v69_v61  ;;  %v74_v3 = vsel %vm60_vm3, %v71_v55, %v73_v62  ;;  %v82_v6 = vmul.u32 %v1578_v23, %v66_v60  ;;  %v269_v7 = vshrl.u32 %v1536_v27, %v268_v59 }
  0x24   :  { %v1609_v9 = vmul.u32.u64.low %v1578_v23, %v74_v3  ;;  %v1610_v10 = vmul.u32.u64.high %v1578_v23, %v74_v3, %v1609_v9  ;;  %v1613_v11 = vmul.u32.u64.low %v1578_v23, %v70_v1  ;;  %v1614_v12 = vmul.u32.u64.high %v1578_v23, %v70_v1, %v1613_v11 }
  0x25   :  { %v271_v13 = vshrl.u32 %v1537_v29, %v268_v59  ;;  %v273_v14 = vshll.u32 %v1537_v29, %v267_v51  ;;  %v274_v15 = vshrl.u32 %v1538_v31, %v268_v59  ;;  %v276_v16 = vshll.u32 %v1538_v31, %v267_v51 }
  0x26   :  { %v277_v17 = vshrl.u32 %v1539_v33, %v268_v59  ;;  %v279_v18 = vshll.u32 %v1539_v33, %v267_v51  ;;  %v280_v19 = vshrl.u32 %v1540_v35, %v268_v59  ;;  %v282_v20 = vshll.u32 %v1540_v35, %v267_v51 }
  0x27   :  { %v272_v21 = vor.u32 %v271_v13, %v270_v63  ;;  %v275_v22 = vor.u32 %v274_v15, %v273_v14  ;;  %v283_v23 = vshrl.u32 %v1541_v42, %v268_v59  ;;  %vm285_vm6 = vcmp.lt.s32.totalorder %v266_v50, 1 }
  0x28   :  { %vm84_vm7 = vc.u32 %v1610_v10, %v1613_v11  ;;  %v85_v26 = vadd.s32 1, %v1614_v12  ;;  %v278_v28 = vor.u32 %v277_v17, %v276_v16  ;;  %v281_v32 = vor.u32 %v280_v19, %v279_v18 }
  0x29   :  { %v284_v34 = vor.u32 %v283_v23, %v282_v20  ;;  %vm286_vm8 = vcmp.lt.s32.totalorder %v266_v50, 2  ;;  %vm287_vm9 = vcmp.lt.s32.totalorder %v266_v50, 3  ;;  %vm288_vm10 = vcmp.lt.s32.totalorder %v266_v50, 4 }
  0x2a   :  { %v86_v36 = vsel %vm84_vm7, %v85_v26, %v1614_v12  ;;  %v289_v37 = vsel %vm285_vm6, %v269_v7, %v272_v21  ;;  %v293_v38 = vsel %vm285_vm6, %v272_v21, %v275_v22  ;;  %v290_v40 = vsel %vm288_vm10, %v278_v28, 2102212464 }
  0x2b   :  { %v87_v39 = vadd.s32 %v86_v36, %v82_v6  ;;  %v294_v41 = vsel %vm288_vm10, %v281_v32, 920167782  ;;  %v297_v43 = vsel %vm285_vm6, %v275_v22, %v278_v28  ;;  %v291_v44 = vsel %vm287_vm9, %v275_v22, %v290_v40 }
  0x2c   :  { %v295_v45 = vsel %vm287_vm9, %v278_v28, %v294_v41  ;;  %v298_v46 = vsel %vm288_vm10, %v284_v34, 1326507024  ;;  %vm485_vm11 = vcmp.gt.s32.totalorder %v484_v30, 0  ;;  %v474_v49 = vand.u32 2147483647, %v1569_v5 }
  0x2d   :  { %v88_v25 = vadd.s32 536870912, %v87_v39  ;;  %v296_v47 = vsel %vm286_vm8, %v293_v38, %v295_v45  ;;  %v299_v48 = vsel %vm287_vm9, %v281_v32, %v298_v46  ;;  %v292_v51 = vsel %vm286_vm8, %v289_v37, %v291_v44 }
  0x2e   :  { %v300_v52 = vsel %vm286_vm8, %v297_v43, %v299_v48  ;;  %v1639_v53 = vmul.u32.u64.low %v1580_v24, %v296_v47  ;;  %v1640_v54 = vmul.u32.u64.high %v1580_v24, %v296_v47, %v1639_v53  ;;  %v486_v58 = vsel %vm485_vm11, %v484_v30, 0 }
  0x2f   :  { %v89_v55 = vshrl.u32 %v88_v25, 30  ;;  %v1644_v56 = vmul.u32.u64.low %v1580_v24, %v300_v52  ;;  %v1645_v57 = vmul.u32.u64.high %v1580_v24, %v300_v52, %v1644_v56  ;;  %v488_v59 = vand.u32 31, %v486_v58 }
  0x30   :  { %v308_v61 = vmul.u32 %v1580_v24, %v292_v51  ;;  %v311_v62 = vadd.s32 1, %v1640_v54  ;;  %v481_v50 = vand.u32 8388607, %v474_v49  ;;  %v1654_v1 = vmul.f32 8.0, %v1558_v0 }
  0x31   :  { %v90_v60 = vshll.u32 %v89_v55, 30  ;;  %vm310_vm12 = vc.u32 %v1645_v57, %v1639_v53  ;;  %v489_v6 = vsub.s32 32, %v488_v59  ;;  %v113_v14 = vsub.s32 4, %v89_v55 }
  0x32   :  { %v312_v3 = vsel %vm310_vm12, %v311_v62, %v1640_v54  ;;  %v482_v12 = vor.u32 8388608, %v481_v50  ;;  %v700_v24 = vand.u32 2147483647, %v1654_v1  ;;  %v703_v15 = vand.u32 2139095040, %v1654_v1 }
  0x33   :  { %v91_v63 = vsub.s32 %v87_v39, %v90_v60  ;;  %v313_v9 = vadd.s32 %v312_v3, %v308_v61  ;;  %v491_v17 = vshll.u32 %v1536_v27, %v488_v59  ;;  %v492_v18 = vshrl.u32 %v1537_v29, %v489_v6 }
  0x34   :  { %v494_v19 = vshll.u32 %v1537_v29, %v488_v59  ;;  %v495_v21 = vshrl.u32 %v1538_v31, %v489_v6  ;;  %v497_v22 = vshll.u32 %v1538_v31, %v488_v59  ;;  %v498_v23 = vshrl.u32 %v1539_v33, %v489_v6 }
  0x35   :  { %v93_v7 = vsub.s32 0, %v91_v63  ;;  %v314_v16 = vadd.s32 536870912, %v313_v9  ;;  %v1668_v28 = vshll.u32 %v482_v12, 8  ;;  %v1672_v30 = vand.u32 8388607, %v700_v24 }
  0x36   :  { %v1675_v32 = vmul.f32 16.0, %v1558_v0  ;;  %v83_v36 = vadd.s32 %v1613_v11, %v1610_v10  ;;  %v500_v38 = vshll.u32 %v1539_v33, %v488_v59  ;;  %v501_v39 = vshrl.u32 %v1540_v35, %v489_v6 }
  0x37   :  { %v1385_v13 = vmin.u32 %v93_v7, %v91_v63  ;;  %v1666_v26 = vshrl.u32 %v314_v16, 30  ;;  %v114_v40 = vsel %vm29_vm13, %v113_v14, %v89_v55  ;;  %v487_v43 = vshrl.u32 %v486_v58, 5 }
  0x38   :  { %v704_v44 = vshrl.u32 %v703_v15, 23  ;;  %v493_v2 = vor.u32 %v492_v18, %v491_v17  ;;  %v496_v45 = vor.u32 %v495_v21, %v494_v19  ;;  %v499_v46 = vor.u32 %v498_v23, %v497_v22 }
  0x39   :  { %v95_v20 = vclz %v1385_v13  ;;  %v316_v41 = vshll.u32 %v1666_v26, 30  ;;  %v503_v10 = vshll.u32 %v1540_v35, %v488_v59  ;;  %v504_v11 = vshrl.u32 %v1541_v42, %v489_v6 }
  0x3a   :  { %v502_v54 = vor.u32 %v501_v39, %v500_v38  ;;  %v490_v56 = vshrl.u32 %v1536_v27, %v489_v6  ;;  %vm506_vm0 = vcmp.lt.s32.totalorder %v487_v43, 1  ;;  %vm509_vm1 = vcmp.lt.s32.totalorder %v487_v43, 4 }
  0x3b   :  { %v1386_v37 = vadd.s32 4294967294, %v95_v20  ;;  %v1690_v47 = vsub.s32 %v313_v9, %v316_v41  ;;  %v309_v61 = vadd.s32 %v1639_v53, %v1645_v57  ;;  %v511_v62 = vsel %vm509_vm1, %v499_v46, 2102212464 }
  0x3c   :  { %v505_v50 = vor.u32 %v504_v11, %v503_v10  ;;  %vm507_vm2 = vcmp.lt.s32.totalorder %v487_v43, 2  ;;  %vm508_vm3 = vcmp.lt.s32.totalorder %v487_v43, 3  ;;  %vm255_vm4 = vcmp.lt.s32.totalorder %v1566_v4, 0 }
  0x3d   :  { %vm1387_vm15 = vcmp.lt.s32.totalorder %v1386_v37, 0  ;;  %v319_v55 = vsub.s32 0, %v1690_v47  ;;  %v514_v6 = vsel %vm506_vm0, %v493_v2, %v496_v45  ;;  %v515_v7 = vsel %vm509_vm1, %v502_v54, 920167782 }
  0x3e   :  { %v98_v25 = vsel %vm1387_vm15, 0, %v1386_v37  ;;  %v116_v9 = vsel %vm1679_vm14, 0, %v114_v40  ;;  %v510_v53 = vsel %vm506_vm0, %v490_v56, %v493_v2  ;;  %v512_v57 = vsel %vm508_vm3, %v496_v45, %v511_v62 }
  0x3f   :  { %v99_v48 = vsub.s32 32, %v98_v25  ;;  %v100_v51 = vshll.u32 %v91_v63, %v98_v25  ;;  %v103_v52 = vsub.s32 4294967266, %v98_v25  ;;  %v1393_v59 = vmin.u32 %v319_v55, %v1690_v47 }
  0x40   :  { %v516_v15 = vsel %vm508_vm3, %v499_v46, %v515_v7  ;;  %v518_v16 = vsel %vm506_vm0, %v496_v45, %v499_v46  ;;  %vm1711_vm5 = vcmp.le.f32.partialorder %v253_v8, 0.7853982  ;;  %v339_v19 = vsub.s32 4, %v1666_v26 }
  0x41   :  { %v101_v58 = vshrl.u32 %v83_v36, %v99_v48  ;;  %v104_v60 = vadd.s32 127, %v103_v52  ;;  %v321_v12 = vclz %v1393_v59  ;;  %v517_v20 = vsel %vm507_vm2, %v514_v6, %v516_v15 }
  0x42   :  { %v519_v21 = vsel %vm509_vm1, %v505_v50, 1326507024  ;;  %v1720_v36 = vmul.u32.u64.low %v1668_v28, %v517_v20  ;;  %v1721_v37 = vmul.u32.u64.high %v1668_v28, %v517_v20, %v1720_v36  ;;  %v513_v8 = vsel %vm507_vm2, %v510_v53, %v512_v57 }
  0x43   :  { %v102_v63 = vor.u32 %v101_v58, %v100_v51  ;;  %v105_v3 = vshll.u32 %v104_v60, 23  ;;  %v1394_v18 = vadd.s32 4294967294, %v321_v12  ;;  %v520_v23 = vsel %vm508_vm3, %v502_v54, %v519_v21 }
  0x44   :  { %v521_v38 = vsel %vm507_vm2, %v518_v16, %v520_v23  ;;  %v1408_v39 = vadd.s32 4294967169, %v704_v44  ;;  %v529_v51 = vmul.u32 %v1668_v28, %v513_v8  ;;  %v532_v52 = vadd.s32 1, %v1721_v37 }
  0x45   :  { %v106_v13 = vor.u32 4788187, %v105_v3  ;;  %v109_v14 = vcvt.s32.f32 %v102_v63  ;;  %vm1395_vm6 = vcmp.lt.s32.totalorder %v1394_v18, 0  ;;  %v708_v43 = vor.u32 8388608, %v1672_v30 }
  0x46   :  { %v324_v41 = vsel %vm1395_vm6, 0, %v1394_v18  ;;  %v1727_v2 = vmul.u32.u64.low %v1668_v28, %v521_v38  ;;  %v1728_v45 = vmul.u32.u64.high %v1668_v28, %v521_v38, %v1727_v2  ;;  %v710_v11 = vadd.s32 1, %v1408_v39 }
  0x47   :  { %v107_v22 = vand.u32 2147483647, %v106_v13  ;;  %v325_v46 = vsub.s32 32, %v324_v41  ;;  %v326_v25 = vshll.u32 %v1690_v47, %v324_v41  ;;  %v329_v10 = vsub.s32 4294967266, %v324_v41 }
  0x48   :  { %v340_v55 = vsel %vm255_vm4, %v339_v19, %v1666_v26  ;;  %vm711_vm7 = vcmp.gt.s32.totalorder %v710_v11, 0  ;;  %v120_v47 = vadd.s32 3, %v116_v9  ;;  %vm531_vm8 = vc.u32 %v1728_v45, %v1720_v36 }
  0x49   :  { %v110_v40 = vmul.f32 %v109_v14, %v107_v22  ;;  %v327_v54 = vshrl.u32 %v309_v61, %v325_v46  ;;  %v330_v44 = vadd.s32 127, %v329_v10  ;;  %v712_v58 = vsel %vm711_vm7, %v710_v11, 0 }
  0x4a   :  { %v533_v62 = vsel %vm531_vm8, %v532_v52, %v1721_v37  ;;  %v342_v26 = vsel %vm1711_vm5, 0, %v340_v55  ;;  %v714_v50 = vand.u32 31, %v712_v58  ;;  %v1747_v63 = vand.u32 3, %v116_v9 }
  0x4b   :  { %v111_v48 = vxor.u32 2147483648, %v110_v40  ;;  %v328_v60 = vor.u32 %v327_v54, %v326_v25  ;;  %v331_v61 = vshll.u32 %v330_v44, 23  ;;  %v534_v59 = vadd.s32 %v533_v62, %v529_v51 }
  0x4c   :  { %v1749_v7 = vand.u32 3, %v120_v47  ;;  %v715_v34 = vsub.s32 32, %v714_v50  ;;  %v921_v53 = vand.u32 2147483647, %v1675_v32  ;;  %v346_v13 = vadd.s32 3, %v342_v26 }
  0x4d   :  { %v112_v56 = vsel %vm29_vm13, %v111_v48, %v110_v40  ;;  %v332_v3 = vor.u32 4788187, %v331_v61  ;;  %v335_v6 = vcvt.s32.f32 %v328_v60  ;;  %v535_v12 = vadd.s32 536870912, %v534_v59 }
  0x4e   :  { %v115_v28 = vsel %vm1679_vm14, %v1558_v0, %v112_v56  ;;  %v717_v14 = vshll.u32 %v1536_v27, %v714_v50  ;;  %v720_v15 = vshll.u32 %v1537_v29, %v714_v50  ;;  %v718_v18 = vshrl.u32 %v1537_v29, %v715_v34 }
  0x4f   :  { %1467 = vcosq.f32 %v115_v28  ;;  %v333_v57 = vand.u32 2147483647, %v332_v3  ;;  %v1754_v16 = vshrl.u32 %v535_v12, 30  ;;  %v723_v9 = vshll.u32 %v1538_v31, %v714_v50 }
  0x50   :  { %1469 = vsinq.f32 %v115_v28  ;;  %v726_v19 = vshll.u32 %v1539_v33, %v714_v50  ;;  %vm237_vm9 = vcmp.eq.s32.totalorder %v1747_v63, 2  ;;  %v721_v21 = vshrl.u32 %v1538_v31, %v715_v34 }
  0x51   :  { %v336_v20 = vmul.f32 %v335_v6, %v333_v57  ;;  %v724_v22 = vshrl.u32 %v1539_v33, %v715_v34  ;;  %v727_v23 = vshrl.u32 %v1540_v35, %v715_v34  ;;  %vm123_vm10 = vcmp.eq.s32.totalorder %v1749_v7, 0 }
  0x52   :  { %vm126_vm11 = vcmp.eq.s32.totalorder %v1749_v7, 2  ;;  %vm234_vm12 = vcmp.eq.s32.totalorder %v1747_v63, 0  ;;  %v537_v37 = vshll.u32 %v1754_v16, 30  ;;  %v1767_v8 = vshrl.u32 %v712_v58, 5 }
  0x53   :  { %vm122_vm13 = vcmp.lt.s32.totalorder %v1749_v7, 2  ;;  %vm233_vm14 = vcmp.lt.s32.totalorder %v1747_v63, 2  ;;  %v337_v38 = vxor.u32 2147483648, %v336_v20  ;;  %v1771_v39 = vand.u32 3, %v346_v13 }
  0x54   :  { %v1773_v40 = vand.u32 3, %v342_v26  ;;  %v924_v41 = vand.u32 2139095040, %v1675_v32  ;;  %vm119_vm15 = vweird.f32 %v1558_v0  ;;  %v1777_v2 = vsub.s32 %v534_v59, %v537_v37 }
  0x55   :  { %v719_v46 = vor.u32 %v718_v18, %v717_v14  ;;  %v729_v25 = vshll.u32 %v1540_v35, %v714_v50  ;;  %v730_v10 = vshrl.u32 %v1541_v42, %v715_v34  ;;  %v338_v11 = vsel %vm255_vm4, %v337_v38, %v336_v20 }
  0x56   :  { %v722_v48 = vor.u32 %v721_v21, %v720_v15  ;;  %v725_v51 = vor.u32 %v724_v22, %v723_v9  ;;  %v728_v52 = vor.u32 %v727_v23, %v726_v19  ;;  %v341_v54 = vsel %vm1711_vm5, %v1566_v4, %v338_v11 }
  0x57   :  { %v540_v44 = vsub.s32 0, %v1777_v2  ;;  %vm732_vm0 = vcmp.lt.s32.totalorder %v1767_v8, 1  ;;  %vm735_vm1 = vcmp.lt.s32.totalorder %v1767_v8, 4  ;;  %1471 = vcosq.f32 %v341_v54 }
  0x58   :  { %v530_v55 = vadd.s32 %v1720_v36, %v1728_v45  ;;  %v716_v56 = vshrl.u32 %v1536_v27, %v715_v34  ;;  %v1794_v47 = vshll.u32 %v708_v43, 8  ;;  %1473 = vsinq.f32 %v341_v54 }
  0x59   :  { %v1401_v17 = vmin.u32 %v540_v44, %v1777_v2  ;;  %vm734_vm2 = vcmp.lt.s32.totalorder %v1767_v8, 3  ;;  %v737_v58 = vsel %vm735_vm1, %v725_v51, 2102212464  ;;  %v731_v60 = vor.u32 %v730_v10, %v729_v25 }
  0x5a   :  { %vm733_vm3 = vcmp.lt.s32.totalorder %v1767_v8, 2  ;;  %v740_v36 = vsel %vm732_vm0, %v719_v46, %v722_v48  ;;  %v741_v30 = vsel %vm735_vm1, %v728_v52, 920167782  ;;  %v560_v62 = vsub.s32 4, %v1754_v16 }
  0x5b   :  { %v542_v61 = vclz %v1401_v17  ;;  %v925_v26 = vshrl.u32 %v924_v41, 23  ;;  %v736_v50 = vsel %vm732_vm0, %v716_v56, %v719_v46  ;;  %v738_v3 = vsel %vm734_vm2, %v722_v48, %v737_v58 }
  0x5c   :  { %v1468_v28 = vpop.eup %1467  ;;  %v742_v6 = vsel %vm734_vm2, %v725_v51, %v741_v30  ;;  %vm460_vm4 = vcmp.eq.s32.totalorder %v1773_v40, 0  ;;  %vm476_vm5 = vcmp.lt.s32.totalorder %v1569_v5, 0  ;;  %v744_v18 = vsel %vm732_vm0, %v722_v48, %v725_v51 }
  0x5d   :  { %v1470_v45 = vpop.eup %1469  ;;  %v127_v43 = vxor.u32 2147483648, %v1468_v28  ;;  %v1402_v57 = vadd.s32 4294967294, %v542_v61  ;;  %v743_v13 = vsel %vm733_vm3, %v740_v36, %v742_v6  ;;  %v745_v9 = vsel %vm735_vm1, %v731_v60, 1326507024 }
  0x5e   :  { %v124_v59 = vxor.u32 2147483648, %v1470_v45  ;;  %vm459_vm6 = vcmp.lt.s32.totalorder %v1773_v40, 2  ;;  %v746_v21 = vsel %vm734_vm2, %v728_v52, %v745_v9  ;;  %vm345_vm8 = vweird.f32 %v1566_v4 }
  0x5f   :  { %v128_v12 = vsel %vm126_vm11, %v127_v43, %v1470_v45  ;;  %v239_v34 = vsel %vm237_vm9, %v127_v43, %v1470_v45  ;;  %vm1403_vm7 = vcmp.lt.s32.totalorder %v1402_v57, 0  ;;  %v747_v7 = vsel %vm733_vm3, %v744_v18, %v746_v21 }
  0x60   :  { %v125_v14 = vsel %vm123_vm10, %v1468_v28, %v124_v59  ;;  %v236_v15 = vsel %vm234_vm12, %v1468_v28, %v124_v59  ;;  %v545_v37 = vsel %vm1403_vm7, 0, %v1402_v57  ;;  %vm1844_vm9 = vcmp.le.f32.partialorder %v474_v49, 0.7853982 }
  0x61   :  { %v129_v19 = vsel %vm122_vm13, %v125_v14, %v128_v12  ;;  %v240_v20 = vsel %vm233_vm14, %v236_v15, %v239_v34  ;;  %v546_v10 = vsub.s32 32, %v545_v37  ;;  %v547_v11 = vshll.u32 %v1777_v2, %v545_v37 }
  0x62   :  { %v130_v22 = vsel %vm119_vm15, nan, %v129_v19  ;;  %v241_v23 = vsel %vm119_vm15, nan, %v240_v20  ;;  %v550_v48 = vsub.s32 4294967266, %v545_v37  ;;  %v739_v51 = vsel %vm733_vm3, %v736_v50, %v738_v3 }
  0x63   :  { %v133_v63 = vrot.slane %v130_v22, 5  ;;  %v132_v38 = vcombine.high %v130_v22, %v130_v22  ;;  %v244_v41 = vrot.slane %v241_v23, 2  ;;  %v243_v46 = vcombine.high %v241_v23, %v241_v23 }
  0x64   :  { %v1852_v44 = vmul.u32.u64.low %v1794_v47, %v747_v7  ;;  %v1853_v56 = vmul.u32.u64.high %v1794_v47, %v747_v7, %v1852_v44  ;;  %v548_v17 = vshrl.u32 %v530_v55, %v546_v10  ;;  %v551_v49 = vadd.s32 127, %v550_v48  ;;  %v1472_v2 = vpop.eup %1471 }
  0x65   :  { %137 = vst [vmem:[#allocation5] sm:$0x38] %v133_v63  ;;  %v134_v52 = vrot.slane %v132_v38, 5  ;;  %248 = vst [vmem:[#allocation5 + $0x10] ss:$-12 sps:$4 sm:$0xc1] %v244_v41   ;;  %v1856_v58 = vmul.u32.u64.low %v1794_v47, %v743_v13  ;;  %v1857_v28 = vmul.u32.u64.high %v1794_v47, %v743_v13, %v1856_v58  ;;  %v1474_v60 = vpop.eup %1473  ;;  %v561_v43 = vsel %vm476_vm5, %v560_v62, %v1754_v16 }
  0x66   :  { %v245_v54 = vrot.slane %v243_v46, 2  ;;  %vm348_vm10 = vcmp.lt.s32.totalorder %v1771_v39, 2  ;;  %vm352_vm11 = vcmp.eq.s32.totalorder %v1771_v39, 2  ;;  %vm463_vm12 = vcmp.eq.s32.totalorder %v1773_v40, 2 }
  0x67   :  { %138 = vst [vmem:[#allocation5 + $0x8] sm:$0x38] %v134_v52  ;;  %v1416_v8 = vadd.s32 4294967169, %v925_v26  ;;  %vm349_vm13 = vcmp.eq.s32.totalorder %v1771_v39, 0  ;;  %v353_v55 = vxor.u32 2147483648, %v1472_v2  ;;  %v549_v36 = vor.u32 %v548_v17, %v547_v11 }
  0x68   :  { %249 = vst [vmem:[#allocation5 + $0x18] ss:$-12 sps:$4 sm:$0xc1] %v245_v54   ;;  %v552_v30 = vshll.u32 %v551_v49, 23  ;;  %v350_v45 = vxor.u32 2147483648, %v1474_v60  ;;  %v755_v61 = vmul.u32 %v1794_v47, %v739_v51  ;;  %vm757_vm14 = vc.u32 %v1853_v56, %v1856_v58 }
  0x69   :  { %v354_v59 = vsel %vm352_vm11, %v353_v55, %v1474_v60  ;;  %v465_v50 = vsel %vm463_vm12, %v353_v55, %v1474_v60  ;;  %v556_v26 = vcvt.s32.f32 %v549_v36  ;;  %v758_v34 = vadd.s32 1, %v1857_v28 }
  0x6a   :  { %v553_v3 = vor.u32 4788187, %v552_v30  ;;  %v351_v6 = vsel %vm349_vm13, %v1472_v2, %v350_v45  ;;  %v462_v12 = vsel %vm460_vm4, %v1472_v2, %v350_v45  ;;  %v931_v57 = vadd.s32 1, %v1416_v8 }
  0x6b   :  { %v355_v13 = vsel %vm348_vm10, %v351_v6, %v354_v59  ;;  %v466_v16 = vsel %vm459_vm6, %v462_v12, %v465_v50  ;;  %v563_v62 = vsel %vm1844_vm9, 0, %v561_v43  ;;  %v759_v18 = vsel %vm757_vm14, %v758_v34, %v1857_v28 }
  0x6c   :  { %v554_v47 = vand.u32 2147483647, %v553_v3  ;;  %v356_v14 = vsel %vm345_vm8, nan, %v355_v13  ;;  %v467_v15 = vsel %vm345_vm8, nan, %v466_v16  ;;  %vm932_vm15 = vcmp.gt.s32.totalorder %v931_v57, 0 }
  0x6d   :  { %v359_v9 = vrot.slane %v356_v14, 7  ;;  %v358_v19 = vcombine.high %v356_v14, %v356_v14  ;;  %v469_v39 = vcombine.low %v467_v15, %v467_v15  ;;  %472 = vst [vmem:[#allocation5 + $0x18] sm:$0x70] %v467_v15  ;;  %v760_v40 = vadd.s32 %v759_v18, %v755_v61 }
  0x6e   :  { %v557_v20 = vmul.f32 %v556_v26, %v554_v47  ;;  %v933_v21 = vsel %vm932_vm15, %v931_v57, 0  ;;  %v567_v7 = vadd.s32 3, %v563_v62  ;;  %v1884_v63 = vand.u32 3, %v563_v62 }
  0x6f   :  { %363 = vst [vmem:[#allocation5 + $0x10] sm:$0xe] %v359_v9  ;;  %v360_v22 = vrot.slane %v358_v19, 7  ;;  %471 = vst [vmem:[#allocation5 + $0x10] sm:$0x70] %v469_v39  ;;  %v935_v37 = vand.u32 31, %v933_v21  ;;  %vm566_vm8 = vweird.f32 %v1569_v5  ;;  %v756_v47 = vadd.s32 %v1856_v58, %v1853_v56 }
  0x70   :  { %v558_v23 = vxor.u32 2147483648, %v557_v20  ;;  %v761_v4 = vadd.s32 536870912, %v760_v40  ;;  %v928_v41 = vand.u32 8388607, %v921_v53  ;;  %v1890_v46 = vshrl.u32 %v933_v21, 5 }
  0x71   :  { %364 = vst [vmem:[#allocation5 + $0x18] sm:$0xe] %v360_v22  ;;  %v936_v10 = vsub.s32 32, %v935_v37  ;;  %v938_v51 = vshll.u32 %v1536_v27, %v935_v37  ;;  %v941_v52 = vshll.u32 %v1537_v29, %v935_v37  ;;  %v947_v17 = vshll.u32 %v1539_v33, %v935_v37 }
  0x72   :  { %v559_v38 = vsel %vm476_vm5, %v558_v23, %v557_v20  ;;  %v1895_v48 = vshrl.u32 %v761_v4, 30  ;;  %v944_v28 = vshll.u32 %v1538_v31, %v935_v37  ;;  %v950_v8 = vshll.u32 %v1540_v35, %v935_v37 }
  0x73   :  { %v562_v11 = vsel %vm1844_vm9, %v1569_v5, %v559_v38  ;;  %v939_v54 = vshrl.u32 %v1537_v29, %v936_v10  ;;  %v942_v44 = vshrl.u32 %v1538_v31, %v936_v10  ;;  %v945_v25 = vshrl.u32 %v1539_v33, %v936_v10 }
  0x74   :  { %1475 = vcosq.f32 %v562_v11  ;;  %v763_v49 = vshll.u32 %v1895_v48, 30  ;;  %v948_v2 = vshrl.u32 %v1540_v35, %v936_v10  ;;  %v1908_v60 = vmul.f32 32.0, %v1558_v0 }
  0x75   :  { %1477 = vsinq.f32 %v562_v11  ;;  %v1910_v55 = vand.u32 3, %v567_v7  ;;  %v929_v30 = vor.u32 8388608, %v928_v41  ;;  %v951_v45 = vshrl.u32 %v1541_v42, %v936_v10 }
  0x76   :  { %v1912_v36 = vsub.s32 %v760_v40, %v763_v49  ;;  %v940_v43 = vor.u32 %v939_v54, %v938_v51  ;;  %v943_v61 = vor.u32 %v942_v44, %v941_v52  ;;  %v949_v59 = vor.u32 %v948_v2, %v947_v17 }
  0x77   :  { %vm686_vm0 = vcmp.eq.s32.totalorder %v1884_v63, 2  ;;  %v946_v3 = vor.u32 %v945_v25, %v944_v28  ;;  %vm953_vm1 = vcmp.lt.s32.totalorder %v1890_v46, 1  ;;  %vm683_vm2 = vcmp.eq.s32.totalorder %v1884_v63, 0 }
  0x78   :  { %v766_v50 = vsub.s32 0, %v1912_v36  ;;  %v937_v0 = vshrl.u32 %v1536_v27, %v936_v10  ;;  %v952_v26 = vor.u32 %v951_v45, %v950_v8  ;;  %vm956_vm3 = vcmp.lt.s32.totalorder %v1890_v46, 4 }
  0x79   :  { %v1150_v6 = vand.u32 2139095040, %v1908_v60  ;;  %vm569_vm4 = vcmp.lt.s32.totalorder %v1910_v55, 2  ;;  %vm570_vm5 = vcmp.eq.s32.totalorder %v1910_v55, 0  ;;  %vm682_vm6 = vcmp.lt.s32.totalorder %v1884_v63, 2 }
  0x7a   :  { %v1409_v12 = vmin.u32 %v766_v50, %v1912_v36  ;;  %vm955_vm7 = vcmp.lt.s32.totalorder %v1890_v46, 3  ;;  %v1927_v34 = vshll.u32 %v929_v30, 8  ;;  %vm954_vm9 = vcmp.lt.s32.totalorder %v1890_v46, 2 }
  0x7b   :  { %v958_v57 = vsel %vm956_vm3, %v946_v3, 2102212464  ;;  %v961_v13 = vsel %vm953_vm1, %v940_v43, %v943_v61  ;;  %v962_v16 = vsel %vm956_vm3, %v949_v59, 920167782  ;;  %vm573_vm10 = vcmp.eq.s32.totalorder %v1910_v55, 2 }
  0x7c   :  { %v768_v62 = vclz %v1409_v12  ;;  %v965_v14 = vsel %vm953_vm1, %v943_v61, %v946_v3  ;;  %v957_v15 = vsel %vm953_vm1, %v937_v0, %v940_v43  ;;  %v963_v18 = vsel %vm955_vm7, %v946_v3, %v962_v16 }
  0x7d   :  { %v966_v9 = vsel %vm956_vm3, %v952_v26, 1326507024  ;;  %v1151_v19 = vshrl.u32 %v1150_v6, 23  ;;  %v959_v20 = vsel %vm955_vm7, %v943_v61, %v958_v57  ;;  %v964_v56 = vsel %vm954_vm9, %v961_v13, %v963_v18 }
  0x7e   :  { %v1410_v39 = vadd.s32 4294967294, %v768_v62  ;;  %v967_v58 = vsel %vm955_vm7, %v949_v59, %v966_v9  ;;  %v1957_v21 = vmul.u32.u64.low %v1927_v34, %v964_v56  ;;  %v1958_v22 = vmul.u32.u64.high %v1927_v34, %v964_v56, %v1957_v21 }
  0x7f   :  { %v968_v40 = vsel %vm954_vm9, %v965_v14, %v967_v58  ;;  %v1147_v23 = vand.u32 2147483647, %v1908_v60  ;;  %v1424_v38 = vadd.s32 4294967169, %v1151_v19  ;;  %v786_v51 = vsub.s32 4, %v1895_v48 }
  0x80   :  { %vm1411_vm11 = vcmp.lt.s32.totalorder %v1410_v39, 0  ;;  %v1963_v7 = vmul.u32.u64.low %v1927_v34, %v968_v40  ;;  %v1964_v4 = vmul.u32.u64.high %v1927_v34, %v968_v40, %v1963_v7  ;;  %v960_v52 = vsel %vm954_vm9, %v957_v15, %v959_v20 }
  0x81   :  { %v1476_v37 = vpop.eup %1475  ;;  %v771_v11 = vsel %vm1411_vm11, 0, %v1410_v39  ;;  %v979_v2 = vadd.s32 1, %v1958_v22  ;;  %v1157_v8 = vadd.s32 1, %v1424_v38  ;;  %v976_v59 = vmul.u32 %v1927_v34, %v960_v52 }
  0x82   :  { %v1478_v41 = vpop.eup %1477  ;;  %v574_v10 = vxor.u32 2147483648, %v1476_v37  ;;  %v772_v44 = vsub.s32 32, %v771_v11  ;;  %v773_v17 = vshll.u32 %v1912_v36, %v771_v11  ;;  %v776_v49 = vsub.s32 4294967266, %v771_v11 }
  0x83   :  { %v571_v54 = vxor.u32 2147483648, %v1478_v41  ;;  %vm978_vm12 = vc.u32 %v1964_v4, %v1957_v21  ;;  %vm1158_vm13 = vcmp.gt.s32.totalorder %v1157_v8, 0  ;;  %vm702_vm14 = vcmp.lt.s32.totalorder %v1654_v1, 0 }
  0x84   :  { %v575_v28 = vsel %vm573_vm10, %v574_v10, %v1478_v41  ;;  %v688_v25 = vsel %vm686_vm0, %v574_v10, %v1478_v41  ;;  %v774_v45 = vshrl.u32 %v756_v47, %v772_v44  ;;  %v777_v43 = vadd.s32 127, %v776_v49 }
  0x85   :  { %v572_v30 = vsel %vm570_vm5, %v1476_v37, %v571_v54  ;;  %v685_v46 = vsel %vm683_vm2, %v1476_v37, %v571_v54  ;;  %v980_v16 = vsel %vm978_vm12, %v979_v2, %v1958_v22  ;;  %v1159_v14 = vsel %vm1158_vm13, %v1157_v8, 0 }
  0x86   :  { %v576_v36 = vsel %vm569_vm4, %v572_v30, %v575_v28  ;;  %v689_v61 = vsel %vm682_vm6, %v685_v46, %v688_v25  ;;  %v775_v0 = vor.u32 %v774_v45, %v773_v17  ;;  %v778_v26 = vshll.u32 %v777_v43, 23 }
  0x87   :  { %v577_v50 = vsel %vm566_vm8, nan, %v576_v36  ;;  %v690_v3 = vsel %vm566_vm8, nan, %v689_v61  ;;  %v981_v62 = vadd.s32 %v980_v16, %v976_v59  ;;  %v1161_v5 = vand.u32 31, %v1159_v14 }
  0x88   :  { %v580_v6 = vrot.slane %v577_v50, 1  ;;  %v579_v12 = vcombine.high %v577_v50, %v577_v50  ;;  %v693_v55 = vrot.slane %v690_v3, 6  ;;  %v692_v57 = vcombine.high %v690_v3, %v690_v3 }
  0x89   :  { %v779_v13 = vor.u32 4788187, %v778_v26  ;;  %v782_v63 = vcvt.s32.f32 %v775_v0  ;;  %v982_v18 = vadd.s32 536870912, %v981_v62  ;;  %vm1994_vm15 = vcmp.le.f32.partialorder %v700_v24, 0.7853982 }
  0x8a   :  { %584 = vst [vmem:[#allocation5 + $0x20] ss:$-12 sps:$4 sm:$0x83] %v580_v6   ;;  %v581_v34 = vrot.slane %v579_v12, 1  ;;  %697 = vst [vmem:[#allocation5 + $0x20] sm:$0x1c] %v693_v55  ;;  %v787_v56 = vsel %vm702_vm14, %v786_v51, %v1895_v48  ;;  %v1164_v22 = vshll.u32 %v1536_v27, %v1161_v5  ;;  %v1167_v24 = vshll.u32 %v1537_v29, %v1161_v5 }
  0x8b   :  { %v694_v47 = vrot.slane %v692_v57, 6  ;;  %v780_v15 = vand.u32 2147483647, %v779_v13  ;;  %v1154_v39 = vand.u32 8388607, %v1147_v23  ;;  %v1162_v20 = vsub.s32 32, %v1161_v5 }
  0x8c   :  { %585 = vst [vmem:[#allocation5 + $0x28] ss:$-12 sps:$4 sm:$0x83] %v581_v34   ;;  %v2003_v58 = vshrl.u32 %v982_v18, 30  ;;  %v1160_v40 = vshrl.u32 %v1159_v14, 5  ;;  %v1170_v7 = vshll.u32 %v1538_v31, %v1161_v5  ;;  %v1173_v38 = vshll.u32 %v1539_v33, %v1161_v5 }
  0x8d   :  { %698 = vst [vmem:[#allocation5 + $0x28] sm:$0x1c] %v694_v47  ;;  %v783_v19 = vmul.f32 %v782_v63, %v780_v15  ;;  %v1165_v10 = vshrl.u32 %v1537_v29, %v1162_v20  ;;  %v1168_v11 = vshrl.u32 %v1538_v31, %v1162_v20  ;;  %v1176_v48 = vshll.u32 %v1540_v35, %v1161_v5 }
  0x8e   :  { %v984_v41 = vshll.u32 %v2003_v58, 30  ;;  %v1171_v52 = vshrl.u32 %v1539_v33, %v1162_v20  ;;  %v1174_v54 = vshrl.u32 %v1540_v35, %v1162_v20  ;;  %v1177_v44 = vshrl.u32 %v1541_v42, %v1162_v20 }
  0x8f   :  { %v784_v37 = vxor.u32 2147483648, %v783_v19  ;;  %v789_v29 = vsel %vm1994_vm15, 0, %v787_v56  ;;  %v1155_v31 = vor.u32 8388608, %v1154_v39  ;;  %v1166_v25 = vor.u32 %v1165_v10, %v1164_v22 }
  0x90   :  { %v985_v49 = vsub.s32 %v981_v62, %v984_v41  ;;  %v1169_v2 = vor.u32 %v1168_v11, %v1167_v24  ;;  %v1172_v8 = vor.u32 %v1171_v52, %v1170_v7  ;;  %v1175_v33 = vor.u32 %v1174_v54, %v1173_v38 }
  0x91   :  { %v785_v51 = vsel %vm702_vm14, %v784_v37, %v783_v19  ;;  %v1178_v30 = vor.u32 %v1177_v44, %v1176_v48  ;;  %vm1179_vm0 = vcmp.lt.s32.totalorder %v1160_v40, 1  ;;  %v793_v35 = vadd.s32 3, %v789_v29 }
  0x92   :  { %v788_v17 = vsel %vm1994_vm15, %v1654_v1, %v785_v51  ;;  %v987_v28 = vsub.s32 0, %v985_v49  ;;  %vm1182_vm1 = vcmp.lt.s32.totalorder %v1160_v40, 4  ;;  %v1163_v46 = vshrl.u32 %v1536_v27, %v1162_v20 }
  0x93   :  { %1479 = vcosq.f32 %v788_v17  ;;  %vm1181_vm2 = vcmp.lt.s32.totalorder %v1160_v40, 3  ;;  %v1195_v45 = vshll.u32 %v1155_v31, 8  ;;  %vm1180_vm3 = vcmp.lt.s32.totalorder %v1160_v40, 2 }
  0x94   :  { %1481 = vsinq.f32 %v788_v17  ;;  %v1417_v42 = vmin.u32 %v987_v28, %v985_v49  ;;  %v1184_v36 = vsel %vm1182_vm1, %v1172_v8, 2102212464  ;;  %v1187_v61 = vsel %vm1179_vm0, %v1166_v25, %v1169_v2 }
  0x95   :  { %v905_v59 = vand.u32 3, %v789_v29  ;;  %v1188_v50 = vsel %vm1182_vm1, %v1175_v33, 920167782  ;;  %v1191_v3 = vsel %vm1179_vm0, %v1169_v2, %v1172_v8  ;;  %v1192_v0 = vsel %vm1182_vm1, %v1178_v30, 1326507024 }
  0x96   :  { %v989_v43 = vclz %v1417_v42  ;;  %v794_v26 = vand.u32 3, %v793_v35  ;;  %v1189_v12 = vsel %vm1181_vm2, %v1172_v8, %v1188_v50  ;;  %v1193_v55 = vsel %vm1181_vm2, %v1175_v33, %v1192_v0 }
  0x97   :  { %v1183_v57 = vsel %vm1179_vm0, %v1163_v46, %v1166_v25  ;;  %v1185_v13 = vsel %vm1181_vm2, %v1169_v2, %v1184_v36  ;;  %v1190_v27 = vsel %vm1180_vm3, %v1187_v61, %v1189_v12  ;;  %v1194_v63 = vsel %vm1180_vm3, %v1191_v3, %v1193_v55 }
  0x98   :  { %v1418_v6 = vadd.s32 4294967294, %v989_v43  ;;  %v977_v16 = vadd.s32 %v1957_v21, %v1964_v4  ;;  %v2031_v34 = vmul.u32.u64.low %v1195_v45, %v1194_v63  ;;  %v2032_v47 = vmul.u32.u64.high %v1195_v45, %v1194_v63, %v2031_v34 }
  0x99   :  { %v2034_v14 = vmul.u32.u64.low %v1195_v45, %v1190_v27  ;;  %v2035_v15 = vmul.u32.u64.high %v1195_v45, %v1190_v27, %v2034_v14  ;;  %v1186_v19 = vsel %vm1180_vm3, %v1183_v57, %v1185_v13  ;;  %vm906_vm5 = vcmp.lt.s32.totalorder %v905_v59, 2 }
  0x9a   :  { %vm1419_vm4 = vcmp.lt.s32.totalorder %v1418_v6, 0  ;;  %vm907_vm6 = vcmp.eq.s32.totalorder %v905_v59, 0  ;;  %vm910_vm7 = vcmp.eq.s32.totalorder %v905_v59, 2  ;;  %vm799_vm8 = vcmp.eq.s32.totalorder %v794_v26, 2 }
  0x9b   :  { %v992_v62 = vsel %vm1419_vm4, 0, %v1418_v6  ;;  %vm1204_vm9 = vc.u32 %v2032_v47, %v2034_v14  ;;  %vm796_vm10 = vcmp.eq.s32.totalorder %v794_v26, 0  ;;  %v1202_v22 = vmul.u32 %v1195_v45, %v1186_v19 }
  0x9c   :  { %v993_v5 = vsub.s32 32, %v992_v62  ;;  %v994_v18 = vshll.u32 %v985_v49, %v992_v62  ;;  %v997_v9 = vsub.s32 4294967266, %v992_v62  ;;  %v1205_v37 = vadd.s32 1, %v2035_v15 }
  0x9d   :  { %vm795_vm11 = vcmp.lt.s32.totalorder %v794_v26, 2  ;;  %vm792_vm12 = vweird.f32 %v1654_v1  ;;  %vm923_vm13 = vcmp.lt.s32.totalorder %v1675_v32, 0  ;;  %v1007_v30 = vsub.s32 4, %v2003_v58 }
  0x9e   :  { %v995_v21 = vshrl.u32 %v977_v16, %v993_v5  ;;  %v998_v4 = vadd.s32 127, %v997_v9  ;;  %v1206_v10 = vsel %vm1204_vm9, %v1205_v37, %v2035_v15  ;;  %vm922_vm14 = vcmp.le.f32.partialorder %v921_v53, 0.7853982 }
  0x9f   :  { %v1207_v17 = vadd.s32 %v1206_v10, %v1202_v22  ;;  %v1008_v43 = vsel %vm923_vm13, %v1007_v30, %v2003_v58  ;;  %v1203_v55 = vadd.s32 %v2034_v14, %v2032_v47 }
  0xa0   :  { %v1480_v39 = vpop.eup %1479  ;;  %v996_v40 = vor.u32 %v995_v21, %v994_v18  ;;  %v999_v7 = vshll.u32 %v998_v4, 23  ;;  %v1010_v50 = vsel %vm922_vm14, 0, %v1008_v43 }
  0xa1   :  { %v1482_v20 = vpop.eup %1481  ;;  %v800_v56 = vxor.u32 2147483648, %v1480_v39  ;;  %v1208_v2 = vadd.s32 536870912, %v1207_v17  ;;  %v1014_v0 = vadd.s32 3, %v1010_v50  ;;  %v1126_v53 = vand.u32 3, %v1010_v50 }
  0xa2   :  { %v797_v24 = vxor.u32 2147483648, %v1482_v20  ;;  %v1000_v51 = vor.u32 4788187, %v999_v7  ;;  %v1003_v52 = vcvt.s32.f32 %v996_v40 }
  0xa3   :  { %v801_v38 = vsel %vm799_vm8, %v800_v56, %v1482_v20  ;;  %v912_v41 = vsel %vm910_vm7, %v800_v56, %v1482_v20  ;;  %v2049_v35 = vshrl.u32 %v1208_v2, 30  ;;  %v1015_v12 = vand.u32 3, %v1014_v0 }
  0xa4   :  { %v798_v11 = vsel %vm796_vm10, %v1480_v39, %v797_v24  ;;  %v909_v48 = vsel %vm907_vm6, %v1480_v39, %v797_v24  ;;  %v1001_v31 = vand.u32 2147483647, %v1000_v51  ;;  %vm1131_vm1 = vcmp.eq.s32.totalorder %v1126_v53, 2 }
  0xa5   :  { %v802_v54 = vsel %vm795_vm11, %v798_v11, %v801_v38  ;;  %v913_v44 = vsel %vm906_vm5, %v909_v48, %v912_v41  ;;  %v1210_v46 = vshll.u32 %v2049_v35, 30  ;;  %vm1020_vm0 = vcmp.eq.s32.totalorder %v1015_v12, 2 }
  0xa6   :  { %v803_v49 = vsel %vm792_vm12, nan, %v802_v54  ;;  %v914_v29 = vsel %vm792_vm12, nan, %v913_v44  ;;  %v1004_v8 = vmul.f32 %v1003_v52, %v1001_v31  ;;  %vm1017_vm2 = vcmp.eq.s32.totalorder %v1015_v12, 0 }
  0xa7   :  { %v806_v28 = vrot.slane %v803_v49, 3  ;;  %v805_v25 = vcombine.high %v803_v49, %v803_v49  ;;  %918 = vst [vmem:[#allocation5 + $0x30] sm:$0x7] %v914_v29  ;;  %v916_v1 = vcombine.high %v914_v29, %v914_v29  ;;  %v1211_v61 = vsub.s32 %v1207_v17, %v1210_v46 }
  0xa8   :  { %v1005_v42 = vxor.u32 2147483648, %v1004_v8  ;;  %vm1127_vm3 = vcmp.lt.s32.totalorder %v1126_v53, 2  ;;  %vm1128_vm4 = vcmp.eq.s32.totalorder %v1126_v53, 0  ;;  %vm1016_vm5 = vcmp.lt.s32.totalorder %v1015_v12, 2 }
  0xa9   :  { %810 = vst [vmem:[#allocation5 + $0x20] sm:$0xe0] %v806_v28  ;;  %v807_v33 = vrot.slane %v805_v25, 3  ;;  %919 = vst [vmem:[#allocation5 + $0x38] sm:$0x7] %v916_v1  ;;  %v1213_v59 = vsub.s32 0, %v1211_v61  ;;  %vm1013_vm6 = vweird.f32 %v1675_v32 }
  0xaa   :  { %v1006_v45 = vsel %vm923_vm13, %v1005_v42, %v1004_v8  ;;  %vm1149_vm7 = vcmp.lt.s32.totalorder %v1908_v60, 0  ;;  %v1233_v48 = vsub.s32 4, %v2049_v35  ;;  %vm1148_vm8 = vcmp.le.f32.partialorder %v1147_v23, 0.7853982 }
  0xab   :  { %811 = vst [vmem:[#allocation5 + $0x28] sm:$0xe0] %v807_v33  ;;  %v1009_v36 = vsel %vm922_vm14, %v1675_v32, %v1006_v45  ;;  %v1425_v3 = vmin.u32 %v1213_v59, %v1211_v61 }
  0xac   :  { %1483 = vcosq.f32 %v1009_v36  ;;  %v1234_v54 = vsel %vm1149_vm7, %v1233_v48, %v2049_v35 }
  0xad   :  { %1485 = vsinq.f32 %v1009_v36  ;;  %v1215_v26 = vclz %v1425_v3  ;;  %v1236_v17 = vsel %vm1148_vm8, 0, %v1234_v54 }
  0xae   :  { %v1240_v49 = vadd.s32 3, %v1236_v17  ;;  %v1352_v31 = vand.u32 3, %v1236_v17 }
  0xaf   :  { %v1426_v6 = vadd.s32 4294967294, %v1215_v26 }
  0xb0   :  { %v1241_v29 = vand.u32 3, %v1240_v49  ;;  %vm1357_vm10 = vcmp.eq.s32.totalorder %v1352_v31, 2  ;;  %vm1354_vm12 = vcmp.eq.s32.totalorder %v1352_v31, 0  ;;  %vm1353_vm14 = vcmp.lt.s32.totalorder %v1352_v31, 2 }
  0xb1   :  { %vm1427_vm15 = vcmp.lt.s32.totalorder %v1426_v6, 0 }
  0xb2   :  { %v1218_v57 = vsel %vm1427_vm15, 0, %v1426_v6  ;;  %vm1246_vm9 = vcmp.eq.s32.totalorder %v1241_v29, 2  ;;  %vm1243_vm11 = vcmp.eq.s32.totalorder %v1241_v29, 0  ;;  %vm1242_vm13 = vcmp.lt.s32.totalorder %v1241_v29, 2 }
  0xb3   :  { %v1219_v13 = vsub.s32 32, %v1218_v57  ;;  %v1220_v58 = vshll.u32 %v1211_v61, %v1218_v57  ;;  %v1223_v27 = vsub.s32 4294967266, %v1218_v57  ;;  %vm1239_vm15 = vweird.f32 %v1908_v60 }
  0xb5   :  { %v1221_v16 = vshrl.u32 %v1203_v55, %v1219_v13  ;;  %v1224_v34 = vadd.s32 127, %v1223_v27 }
  0xb7   :  { %v1222_v18 = vor.u32 %v1221_v16, %v1220_v58  ;;  %v1225_v9 = vshll.u32 %v1224_v34, 23 }
  0xb9   :  { %v1484_v63 = vpop.eup %1483  ;;  %v1226_v21 = vor.u32 4788187, %v1225_v9  ;;  %v1229_v4 = vcvt.s32.f32 %v1222_v18 }
  0xba   :  { %v1486_v62 = vpop.eup %1485  ;;  %v1021_v15 = vxor.u32 2147483648, %v1484_v63 }
  0xbb   :  { %v1018_v5 = vxor.u32 2147483648, %v1486_v62  ;;  %v1227_v24 = vand.u32 2147483647, %v1226_v21 }
  0xbc   :  { %v1022_v47 = vsel %vm1020_vm0, %v1021_v15, %v1486_v62  ;;  %v1133_v14 = vsel %vm1131_vm1, %v1021_v15, %v1486_v62 }
  0xbd   :  { %v1019_v19 = vsel %vm1017_vm2, %v1484_v63, %v1018_v5  ;;  %v1130_v39 = vsel %vm1128_vm4, %v1484_v63, %v1018_v5  ;;  %v1230_v10 = vmul.f32 %v1229_v4, %v1227_v24 }
  0xbe   :  { %v1023_v20 = vsel %vm1016_vm5, %v1019_v19, %v1022_v47  ;;  %v1134_v56 = vsel %vm1127_vm3, %v1130_v39, %v1133_v14 }
  0xbf   :  { %v1024_v22 = vsel %vm1013_vm6, nan, %v1023_v20  ;;  %v1135_v37 = vsel %vm1013_vm6, nan, %v1134_v56  ;;  %v1231_v51 = vxor.u32 2147483648, %v1230_v10 }
  0xc0   :  { %v1027_v40 = vrot.slane %v1024_v22, 5  ;;  %v1026_v7 = vcombine.high %v1024_v22, %v1024_v22  ;;  %v1138_v38 = vrot.slane %v1135_v37, 2  ;;  %v1137_v41 = vcombine.high %v1135_v37, %v1135_v37 }
  0xc1   :  { %v1232_v52 = vsel %vm1149_vm7, %v1231_v51, %v1230_v10 }
  0xc2   :  { %1031 = vst [vmem:[#allocation5 + $0x30] sm:$0x38] %v1027_v40  ;;  %v1028_v11 = vrot.slane %v1026_v7, 5  ;;  %1142 = vst [vmem:[#allocation5 + $0x40] ss:$-12 sps:$4 sm:$0xc1] %v1138_v38   ;;  %v1235_v44 = vsel %vm1148_vm8, %v1908_v60, %v1232_v52 }
  0xc3   :  { %v1139_v32 = vrot.slane %v1137_v41, 2  ;;  %1487 = vcosq.f32 %v1235_v44 }
  0xc4   :  { %1032 = vst [vmem:[#allocation5 + $0x38] sm:$0x38] %v1028_v11  ;;  %1489 = vsinq.f32 %v1235_v44 }
  0xc5   :  { %1143 = vst [vmem:[#allocation5 + $0x48] ss:$-12 sps:$4 sm:$0xc1] %v1139_v32  }
  0xd0   :  { %v1488_v28 = vpop.eup %1487 }
  0xd1   :  { %v1490_v25 = vpop.eup %1489  ;;  %v1247_v23 = vxor.u32 2147483648, %v1488_v28 }
  0xd2   :  { %v1244_v1 = vxor.u32 2147483648, %v1490_v25 }
  0xd3   :  { %v1248_v2 = vsel %vm1246_vm9, %v1247_v23, %v1490_v25  ;;  %v1359_v8 = vsel %vm1357_vm10, %v1247_v23, %v1490_v25 }
  0xd4   :  { %v1245_v33 = vsel %vm1243_vm11, %v1488_v28, %v1244_v1  ;;  %v1356_v30 = vsel %vm1354_vm12, %v1488_v28, %v1244_v1 }
  0xd5   :  { %v1249_v35 = vsel %vm1242_vm13, %v1245_v33, %v1248_v2  ;;  %v1360_v42 = vsel %vm1353_vm14, %v1356_v30, %v1359_v8 }
  0xd6   :  { %v1250_v46 = vsel %vm1239_vm15, nan, %v1249_v35  ;;  %v1361_v45 = vsel %vm1239_vm15, nan, %v1360_v42 }
  0xd7   :  { %v1253_v43 = vrot.slane %v1250_v46, 7  ;;  %v1252_v36 = vcombine.high %v1250_v46, %v1250_v46  ;;  %v1363_v61 = vcombine.low %v1361_v45, %v1361_v45  ;;  %1366 = vst [vmem:[#allocation5 + $0x48] sm:$0x70] %v1361_v45 }
  0xd9   :  { %1257 = vst [vmem:[#allocation5 + $0x40] sm:$0xe] %v1253_v43  ;;  %v1254_v59 = vrot.slane %v1252_v36, 7  ;;  %1365 = vst [vmem:[#allocation5 + $0x40] sm:$0x70] %v1363_v61 }
  0xdb   :  { %1258 = vst [vmem:[#allocation5 + $0x48] sm:$0xe] %v1254_v59 }
  0xdc   :  { %1522 = shalt.err (!%p1519_p9)
}
  0xdd   :  { %s1543_s13 = smov 256   ;;  %s1544_s14 = smov 16  }
  0xde   :  { %1378 = dma.vmem_to_hbm [thread:$0]  %s1373_s11, 1280, %s2070_s1, [#allocation4], %s1543_s13, %s1543_s13, %s1544_s14  }
  0xdf   :  { %1533 = dma.done.wait [#allocation4], 1280  }
  0xe0   :  { %1534 = vsyncadd [#allocation4], 4294966016 }
  0xe1   :  { %1382 = vsyncpa [#allocation3], 1 }
  0xe2   :  { %1383 = vsyncpa [#allocation4], 1 }

</bundles_post_ra>
